<compile_context>
chip_gen: v6e
topology: v6e:2x2x1
jax: 0.10.0
libtpu: 0.0.40
codegen_flags: <defaults>
</compile_context>

<pallas_src>
import functools

import jax
import jax.numpy as jnp
from jax import lax
from jax.experimental import pallas as pl
from jax.experimental.pallas import tpu as pltpu


# ----------------------------------------------------------------------------
# Fused Pallas kernel: all GCN layers + DiffPool for one graph per grid step.
# ----------------------------------------------------------------------------
def _make_fused_kernel(num_gcn):
    """Build a fused kernel for `num_gcn` GCN layers followed by DiffPool."""

    def kernel(x_ref, adj_ref, *refs):
        # refs layout: [w_0, b_0, ..., w_{L-1}, b_{L-1}, w_pool, b_pool,
        #               pool_ref, assign_ref]
        wb = refs[: 2 * num_gcn]
        wp_ref = refs[2 * num_gcn]
        bp_ref = refs[2 * num_gcn + 1]
        pool_ref = refs[2 * num_gcn + 2]
        assign_ref = refs[2 * num_gcn + 3]

        a = adj_ref[...]          # (N, N)
        h = x_ref[...]            # (N, D_in)

        # GCN stack: H <- relu(A @ H @ W + b), reassociated per layer so the
        # cheaper association (smaller intermediate) is used.
        for i in range(num_gcn):
            w = wb[2 * i][...]        # (d_in, d_out)
            b = wb[2 * i + 1][...]    # (1, d_out)
            d_in, d_out = w.shape
            if d_in <= d_out:
                t = jnp.dot(a, h, preferred_element_type=jnp.float32)   # (N, d_in)
                h = jnp.dot(t, w, preferred_element_type=jnp.float32) + b
            else:
                t = jnp.dot(h, w, preferred_element_type=jnp.float32)   # (N, d_out)
                h = jnp.dot(a, t, preferred_element_type=jnp.float32) + b
            h = jnp.maximum(h, 0.0)

        # DiffPool: S = softmax(H @ Wp + bp);  P = S^T @ H.
        logits = jnp.dot(h, wp_ref[...], preferred_element_type=jnp.float32)
        logits = logits + bp_ref[...]                                   # (N, k)
        m = jnp.max(logits, axis=-1, keepdims=True)
        e = jnp.exp(logits - m)
        # Exact reciprocal (keeps sum-to-1 at 1e-5 tolerance).
        s = e * pl.reciprocal(jnp.sum(e, axis=-1, keepdims=True))       # (N, k)
        # S^T @ H without materializing the transpose: contract axis 0 vs 0.
        pool = lax.dot_general(
            s, h,
            dimension_numbers=(((0,), (0,)), ((), ())),
            preferred_element_type=jnp.float32)                         # (k, D)
        pool_ref[...] = pool
        assign_ref[...] = s

    return kernel


# ----------------------------------------------------------------------------
# Wrapper around the single fused pallas_call
# ----------------------------------------------------------------------------
@jax.jit
def gcn_diffpool_forward(params, features, graph):
    B, N, d_in = features.shape
    gcn_wb = params["gcn"]
    num_gcn = len(gcn_wb)
    wp, bp = params["pool_w"], params["pool_b"]
    k = wp.shape[1]
    d_last = gcn_wb[-1][0].shape[1] if num_gcn else d_in

    flat_wb = []
    in_specs = [
        # Per-graph tiles; leading batch dim squeezed out of the kernel refs.
        pl.BlockSpec((None, N, d_in), lambda b: (b, 0, 0)),
        pl.BlockSpec((None, N, N), lambda b: (b, 0, 0)),
    ]
    for (w, b) in gcn_wb:
        flat_wb.extend([w, b])
        # Constant index_map -> weights stay resident in VMEM across the grid.
        in_specs.append(pl.BlockSpec(w.shape, lambda b: (0, 0)))
        in_specs.append(pl.BlockSpec(b.shape, lambda b: (0, 0)))
    in_specs.append(pl.BlockSpec(wp.shape, lambda b: (0, 0)))
    in_specs.append(pl.BlockSpec(bp.shape, lambda b: (0, 0)))

    out_shape = (
        jax.ShapeDtypeStruct((B, k, d_last), jnp.float32),
        jax.ShapeDtypeStruct((B, N, k), jnp.float32),
    )
    out_specs = (
        pl.BlockSpec((None, k, d_last), lambda b: (b, 0, 0)),
        pl.BlockSpec((None, N, k), lambda b: (b, 0, 0)),
    )

    return pl.pallas_call(
        _make_fused_kernel(num_gcn),
        out_shape=out_shape,
        grid=(B,),
        in_specs=in_specs,
        out_specs=out_specs,
        compiler_params=pltpu.CompilerParams(
            dimension_semantics=("parallel",)),   # v7x: 2 TCs split the batch
    )(features, graph, *flat_wb, wp, bp)


# ----------------------------------------------------------------------------
# Parameter construction + pure-JAX reference (for correctness checking)
# ----------------------------------------------------------------------------
def init_params(key, input_dim, channel_sizes):
    """Deterministic Glorot-style init matching the module's __init__ shapes."""
    params = {"gcn": []}
    cur = input_dim
    keys = jax.random.split(key, len(channel_sizes))
    for i, n_ch in enumerate(channel_sizes[:-1]):
        kw, _ = jax.random.split(keys[i])
        scale = (2.0 / (cur + n_ch)) ** 0.5
        w = scale * jax.random.normal(kw, (cur, n_ch), jnp.float32)
        b = jnp.zeros((1, n_ch), jnp.float32)
        params["gcn"].append((w, b))
        cur = n_ch
    k = channel_sizes[-1]
    kw, _ = jax.random.split(keys[-1])
    scale = (2.0 / (cur + k)) ** 0.5
    params["pool_w"] = scale * jax.random.normal(kw, (cur, k), jnp.float32)
    params["pool_b"] = jnp.zeros((1, k), jnp.float32)
    return params


def reference_forward(params, features, graph):
    out = features
    for (w, b) in params["gcn"]:
        out = jax.nn.relu(jnp.einsum("bij,bjd->bid", graph, out) @ w + b)
    logits = out @ params["pool_w"] + params["pool_b"]
    s = jax.nn.softmax(logits, axis=-1)
    pool = jnp.einsum("bnk,bnd->bkd", s, out)
    return pool, s


# ----------------------------------------------------------------------------
# Main
# ----------------------------------------------------------------------------
if __name__ == "__main__":
    B, N = 2, 16                  # batch of 2 graphs, 16 nodes each
    input_dim = 8
    channel_sizes = [32, 16, 4]   # two GCN layers (32, 16) + pool to k=4 clusters

    key = jax.random.PRNGKey(0)
    k_feat, k_adj, k_par = jax.random.split(key, 3)

    features = jax.random.normal(k_feat, (B, N, input_dim), jnp.float32)

    # deterministic symmetric, degree-normalized adjacency with self loops
    raw = jax.random.uniform(k_adj, (B, N, N), jnp.float32)
    adj = (raw + jnp.swapaxes(raw, 1, 2)) * 0.5
    adj = (adj > 0.7).astype(jnp.float32) + jnp.eye(N, dtype=jnp.float32)[None]
    deg = jnp.sum(adj, axis=-1, keepdims=True)
    graph = adj / deg

    params = init_params(k_par, input_dim, channel_sizes)

    pool, assignment = gcn_diffpool_forward(params, features, graph)
    jax.block_until_ready((pool, assignment))

    assert pool.shape == (B, channel_sizes[-1], channel_sizes[-2])
    assert assignment.shape == (B, N, channel_sizes[-1])
    # assignment rows must sum to 1 (softmax)
    assert jnp.allclose(jnp.sum(assignment, axis=-1), 1.0, atol=1e-5)

    # numeric check against a pure-JAX reference
    ref_pool, ref_assign = reference_forward(params, features, graph)
    assert jnp.allclose(pool, ref_pool, atol=1e-4, rtol=1e-4)
    assert jnp.allclose(assignment, ref_assign, atol=1e-5, rtol=1e-5)

    print("KERNEL_OK")
</pallas_src>

<mosaic_0001>
module attributes {stable_mosaic.version = 11 : i64} {
  func.func @kernel(%arg0: i32, %arg1: memref<1x16x8xf32, #tpu.memory_space<vmem>>, %arg2: memref<1x16x16xf32, #tpu.memory_space<vmem>>, %arg3: memref<8x32xf32, #tpu.memory_space<vmem>>, %arg4: memref<1x32xf32, #tpu.memory_space<vmem>>, %arg5: memref<32x16xf32, #tpu.memory_space<vmem>>, %arg6: memref<1x16xf32, #tpu.memory_space<vmem>>, %arg7: memref<16x4xf32, #tpu.memory_space<vmem>>, %arg8: memref<1x4xf32, #tpu.memory_space<vmem>>, %arg9: memref<1x4x16xf32, #tpu.memory_space<vmem>>, %arg10: memref<1x16x4xf32, #tpu.memory_space<vmem>>) attributes {dimension_semantics = [#tpu.dimension_semantics<parallel>], iteration_bounds = array<i64: 2>, scalar_prefetch = 0 : i64, scratch_operands = 0 : i64, tpu.core_type = #tpu.core_type<tc>, window_params = [{transform_indices = @transform_0, window_bounds = array<i64: 1, 16, 8>}, {transform_indices = @transform_1, window_bounds = array<i64: 1, 16, 16>}, {pipeline_mode = #tpu.pipeline_mode<synchronous>, transform_indices = @transform_2, window_bounds = array<i64: 8, 32>}, {pipeline_mode = #tpu.pipeline_mode<synchronous>, transform_indices = @transform_3, window_bounds = array<i64: 1, 32>}, {pipeline_mode = #tpu.pipeline_mode<synchronous>, transform_indices = @transform_4, window_bounds = array<i64: 32, 16>}, {pipeline_mode = #tpu.pipeline_mode<synchronous>, transform_indices = @transform_5, window_bounds = array<i64: 1, 16>}, {pipeline_mode = #tpu.pipeline_mode<synchronous>, transform_indices = @transform_6, window_bounds = array<i64: 16, 4>}, {pipeline_mode = #tpu.pipeline_mode<synchronous>, transform_indices = @transform_7, window_bounds = array<i64: 1, 4>}, {transform_indices = @transform_8, window_bounds = array<i64: 1, 4, 16>}, {transform_indices = @transform_9, window_bounds = array<i64: 1, 16, 4>}]} {
    %c0 = arith.constant 0 : index
    %c0_0 = arith.constant 0 : index
    %c0_1 = arith.constant 0 : index
    %0 = vector.load %arg2[%c0, %c0_0, %c0_1] : memref<1x16x16xf32, #tpu.memory_space<vmem>>, vector<1x16x16xf32>
    %1 = vector.shape_cast %0 : vector<1x16x16xf32> to vector<16x16xf32>
    %c0_2 = arith.constant 0 : index
    %c0_3 = arith.constant 0 : index
    %c0_4 = arith.constant 0 : index
    %2 = vector.load %arg1[%c0_2, %c0_3, %c0_4] : memref<1x16x8xf32, #tpu.memory_space<vmem>>, vector<1x16x8xf32>
    %3 = vector.shape_cast %2 : vector<1x16x8xf32> to vector<16x8xf32>
    %c0_5 = arith.constant 0 : index
    %c0_6 = arith.constant 0 : index
    %4 = vector.load %arg3[%c0_5, %c0_6] : memref<8x32xf32, #tpu.memory_space<vmem>>, vector<8x32xf32>
    %c0_7 = arith.constant 0 : index
    %c0_8 = arith.constant 0 : index
    %5 = vector.load %arg4[%c0_7, %c0_8] : memref<1x32xf32, #tpu.memory_space<vmem>>, vector<1x32xf32>
    %cst = arith.constant dense<0.000000e+00> : vector<16x8xf32>
    %6 = tpu.matmul %1, %3, %cst {dimension_numbers = #tpu.dot_dimension_numbers<[1], [0], [0], [1], [0, 0, 1, 1], [], []>} : vector<16x16xf32>, vector<16x8xf32>, vector<16x8xf32> -> vector<16x8xf32>
    %cst_9 = arith.constant dense<0.000000e+00> : vector<16x32xf32>
    %7 = tpu.matmul %6, %4, %cst_9 {dimension_numbers = #tpu.dot_dimension_numbers<[1], [0], [0], [1], [0, 0, 1, 1], [], []>} : vector<16x8xf32>, vector<8x32xf32>, vector<16x32xf32> -> vector<16x32xf32>
    %8 = vector.broadcast %5 : vector<1x32xf32> to vector<16x32xf32>
    %9 = arith.addf %7, %8 : vector<16x32xf32>
    %cst_10 = arith.constant 0.000000e+00 : f32
    %10 = vector.broadcast %cst_10 : f32 to vector<16x32xf32>
    %11 = arith.maximumf %9, %10 : vector<16x32xf32>
    %c0_11 = arith.constant 0 : index
    %c0_12 = arith.constant 0 : index
    %12 = vector.load %arg5[%c0_11, %c0_12] : memref<32x16xf32, #tpu.memory_space<vmem>>, vector<32x16xf32>
    %c0_13 = arith.constant 0 : index
    %c0_14 = arith.constant 0 : index
    %13 = vector.load %arg6[%c0_13, %c0_14] : memref<1x16xf32, #tpu.memory_space<vmem>>, vector<1x16xf32>
    %cst_15 = arith.constant dense<0.000000e+00> : vector<16x16xf32>
    %14 = tpu.matmul %11, %12, %cst_15 {dimension_numbers = #tpu.dot_dimension_numbers<[1], [0], [0], [1], [0, 0, 1, 1], [], []>} : vector<16x32xf32>, vector<32x16xf32>, vector<16x16xf32> -> vector<16x16xf32>
    %cst_16 = arith.constant dense<0.000000e+00> : vector<16x16xf32>
    %15 = tpu.matmul %1, %14, %cst_16 {dimension_numbers = #tpu.dot_dimension_numbers<[1], [0], [0], [1], [0, 0, 1, 1], [], []>} : vector<16x16xf32>, vector<16x16xf32>, vector<16x16xf32> -> vector<16x16xf32>
    %16 = vector.broadcast %13 : vector<1x16xf32> to vector<16x16xf32>
    %17 = arith.addf %15, %16 : vector<16x16xf32>
    %cst_17 = arith.constant 0.000000e+00 : f32
    %18 = vector.broadcast %cst_17 : f32 to vector<16x16xf32>
    %19 = arith.maximumf %17, %18 : vector<16x16xf32>
    %c0_18 = arith.constant 0 : index
    %c0_19 = arith.constant 0 : index
    %20 = vector.load %arg7[%c0_18, %c0_19] : memref<16x4xf32, #tpu.memory_space<vmem>>, vector<16x4xf32>
    %cst_20 = arith.constant dense<0.000000e+00> : vector<16x4xf32>
    %21 = tpu.matmul %19, %20, %cst_20 {dimension_numbers = #tpu.dot_dimension_numbers<[1], [0], [0], [1], [0, 0, 1, 1], [], []>} : vector<16x16xf32>, vector<16x4xf32>, vector<16x4xf32> -> vector<16x4xf32>
    %c0_21 = arith.constant 0 : index
    %c0_22 = arith.constant 0 : index
    %22 = vector.load %arg8[%c0_21, %c0_22] : memref<1x4xf32, #tpu.memory_space<vmem>>, vector<1x4xf32>
    %23 = vector.broadcast %22 : vector<1x4xf32> to vector<16x4xf32>
    %24 = arith.addf %21, %23 : vector<16x4xf32>
    %cst_23 = arith.constant dense<0xFF800000> : vector<16xf32>
    %25 = vector.multi_reduction <maximumf>, %24, %cst_23 [1] : vector<16x4xf32> to vector<16xf32>
    %26 = vector.shape_cast %25 : vector<16xf32> to vector<16x1xf32>
    %27 = vector.broadcast %26 : vector<16x1xf32> to vector<16x4xf32>
    %28 = arith.subf %24, %27 : vector<16x4xf32>
    %29 = math.exp %28 : vector<16x4xf32>
    %cst_24 = arith.constant dense<0.000000e+00> : vector<16xf32>
    %30 = vector.multi_reduction <add>, %29, %cst_24 [1] : vector<16x4xf32> to vector<16xf32>
    %31 = vector.shape_cast %30 : vector<16xf32> to vector<16x1xf32>
    %32 = tpu.reciprocal %31 : vector<16x1xf32> -> vector<16x1xf32>
    %33 = vector.broadcast %32 : vector<16x1xf32> to vector<16x4xf32>
    %34 = arith.mulf %29, %33 : vector<16x4xf32>
    %cst_25 = arith.constant dense<0.000000e+00> : vector<4x16xf32>
    %35 = tpu.matmul %34, %19, %cst_25 {dimension_numbers = #tpu.dot_dimension_numbers<[0], [0], [1], [1], [0, 1, 1, 1], [], []>} : vector<16x4xf32>, vector<16x16xf32>, vector<4x16xf32> -> vector<4x16xf32>
    %c0_26 = arith.constant 0 : index
    %c0_27 = arith.constant 0 : index
    %c0_28 = arith.constant 0 : index
    %36 = vector.load %arg9[%c0_26, %c0_27, %c0_28] : memref<1x4x16xf32, #tpu.memory_space<vmem>>, vector<1x4x16xf32>
    %37 = vector.shape_cast %36 : vector<1x4x16xf32> to vector<4x16xf32>
    %38 = vector.shape_cast %35 : vector<4x16xf32> to vector<1x4x16xf32>
    tpu.vector_store %arg9[%c0_26, %c0_27, %c0_28], %38 {strides = array<i32>} : memref<1x4x16xf32, #tpu.memory_space<vmem>>, vector<1x4x16xf32>,
    %c0_29 = arith.constant 0 : index
    %c0_30 = arith.constant 0 : index
    %c0_31 = arith.constant 0 : index
    %39 = vector.load %arg10[%c0_29, %c0_30, %c0_31] : memref<1x16x4xf32, #tpu.memory_space<vmem>>, vector<1x16x4xf32>
    %40 = vector.shape_cast %39 : vector<1x16x4xf32> to vector<16x4xf32>
    %41 = vector.shape_cast %34 : vector<16x4xf32> to vector<1x16x4xf32>
    tpu.vector_store %arg10[%c0_29, %c0_30, %c0_31], %41 {strides = array<i32>} : memref<1x16x4xf32, #tpu.memory_space<vmem>>, vector<1x16x4xf32>,
    return
  }
  func.func @transform_0(%arg0: i32) -> (i32, i32, i32) {
    %c0_i32 = arith.constant 0 : i32
    %c0_i32_0 = arith.constant 0 : i32
    %c0_i32_1 = arith.constant 0 : i32
    return %arg0, %c0_i32, %c0_i32_0 : i32, i32, i32
  }
  func.func @transform_1(%arg0: i32) -> (i32, i32, i32) {
    %c0_i32 = arith.constant 0 : i32
    %c0_i32_0 = arith.constant 0 : i32
    %c0_i32_1 = arith.constant 0 : i32
    return %arg0, %c0_i32, %c0_i32_0 : i32, i32, i32
  }
  func.func @transform_2(%arg0: i32) -> (i32, i32) {
    %c0_i32 = arith.constant 0 : i32
    %c0_i32_0 = arith.constant 0 : i32
    %c0_i32_1 = arith.constant 0 : i32
    return %c0_i32, %c0_i32_0 : i32, i32
  }
  func.func @transform_3(%arg0: i32) -> (i32, i32) {
    %c0_i32 = arith.constant 0 : i32
    %c0_i32_0 = arith.constant 0 : i32
    %c0_i32_1 = arith.constant 0 : i32
    return %c0_i32, %c0_i32_0 : i32, i32
  }
  func.func @transform_4(%arg0: i32) -> (i32, i32) {
    %c0_i32 = arith.constant 0 : i32
    %c0_i32_0 = arith.constant 0 : i32
    %c0_i32_1 = arith.constant 0 : i32
    return %c0_i32, %c0_i32_0 : i32, i32
  }
  func.func @transform_5(%arg0: i32) -> (i32, i32) {
    %c0_i32 = arith.constant 0 : i32
    %c0_i32_0 = arith.constant 0 : i32
    %c0_i32_1 = arith.constant 0 : i32
    return %c0_i32, %c0_i32_0 : i32, i32
  }
  func.func @transform_6(%arg0: i32) -> (i32, i32) {
    %c0_i32 = arith.constant 0 : i32
    %c0_i32_0 = arith.constant 0 : i32
    %c0_i32_1 = arith.constant 0 : i32
    return %c0_i32, %c0_i32_0 : i32, i32
  }
  func.func @transform_7(%arg0: i32) -> (i32, i32) {
    %c0_i32 = arith.constant 0 : i32
    %c0_i32_0 = arith.constant 0 : i32
    %c0_i32_1 = arith.constant 0 : i32
    return %c0_i32, %c0_i32_0 : i32, i32
  }
  func.func @transform_8(%arg0: i32) -> (i32, i32, i32) {
    %c0_i32 = arith.constant 0 : i32
    %c0_i32_0 = arith.constant 0 : i32
    %c0_i32_1 = arith.constant 0 : i32
    return %arg0, %c0_i32, %c0_i32_0 : i32, i32, i32
  }
  func.func @transform_9(%arg0: i32) -> (i32, i32, i32) {
    %c0_i32 = arith.constant 0 : i32
    %c0_i32_0 = arith.constant 0 : i32
    %c0_i32_1 = arith.constant 0 : i32
    return %arg0, %c0_i32, %c0_i32_0 : i32, i32, i32
  }
}

</mosaic_0001>

<bundles_post_ra>
// kernel: gcn_diffpool_forward.1
= control target key start
LH: loop header
LB: loop body
LE: loop exit
PB: predicated region body
PF: predicated region fallthrough
CT: control target
= control target key end

     0   :  { %15 = vsyncpa [#allocation3], 0  ;;  %s1469_s0 = inlined_call_operand.vmem [shape: f32[2,16,8], index: 0, kind: input, shape index: {}]   ;;  %s1470_s1 = inlined_call_operand.vmem [shape: f32[2,16,16], index: 1, kind: input, shape index: {}]   ;;  %s1471_s2 = inlined_call_operand.vmem [shape: f32[8,32], index: 2, kind: input, shape index: {}]   ;;  %s1472_s3 = inlined_call_operand.vmem [shape: f32[1,32], index: 3, kind: input, shape index: {}]   ;;  %s1473_s4 = inlined_call_operand.vmem [shape: f32[32,16], index: 4, kind: input, shape index: {}]   ;;  %s1474_s5 = inlined_call_operand.vmem [shape: f32[1,16], index: 5, kind: input, shape index: {}]   ;;  %s1475_s6 = inlined_call_operand.vmem [shape: f32[16,4], index: 6, kind: input, shape index: {}]   ;;  %s1476_s7 = inlined_call_operand.vmem [shape: f32[1,4], index: 7, kind: input, shape index: {}]   ;;  %s1477_s8 = inlined_call_operand.hbm [shape: f32[2,4,16], index: 8, kind: output, shape index: {0}]   ;;  %s1478_s9 = inlined_call_operand.vmem [shape: f32[2,16,4], index: 9, kind: output, shape index: {1}]  }
   0x1   :  { %17 = vsyncpa [#allocation3 + $0x1], 0  ;;  %s1316_s30 = smov 0   ;;  %s1318_s10 = smov 0  }
   0x2   :  { %s1320_s11 = smov 0   ;;  %s1322_s12 = smov 0  }
   0x3 LB: > { %s1337_s13 = sadd.s32 4294967295, %s1261_s12   ;;  %s1052_s14 = sadd.s32 4294967294, %s1261_s12   ;;  %s1261_s12 = sphi %s1322_s12, %s1484_s12   ;;  %s1257_s11 = sphi %s1320_s11, %s1483_s11   ;;  %s1253_s10 = sphi %s1318_s10, %s1482_s10   ;;  %s1249_s30 = sphi %s1316_s30, %s1481_s30  }
   0x4   : > { %s1341_s15 = sadd.s32 1, %s1261_s12   ;;  %s208_s16 = sadd.s32 1, %s1257_s11 }
   0x5   : > { %s205_s17 = ssub.s32 %s1261_s12, %s1341_s15  ;;  %p218_p0 = scmp.ne.s32.totalorder %s1257_s11, %s1253_s10 }
   0x6   : > { %p206_p1 = scmp.eq.s32.totalorder %s205_s17, 0  ;;  %p219_p2 = scmp.eq.s32.totalorder %s1337_s13, 1 }
   0x7   : > { %p224_p3 = scmp.ne.s32.totalorder %s1253_s10, %s1249_s30  ;;  %p225_p4 = scmp.eq.s32.totalorder %s1052_s14, 1 }
   0x8   : > { %s1352_s18 = scalar_select %p206_p1, %s1257_s11, %s208_s16  }
   0x9   : > { %p1354_p5 = por %p219_p2, %p218_p0  ;;  %p1358_p6 = por %p225_p4, %p224_p3 }
   0xa   : > { %p1055_p7 = scmp.ge.s32.totalorder %s1261_s12, 1  ;;  %p303_p8 = scmp.lt.s32.totalorder %s1261_s12, 3 }
   0xc   : > { %p304_p9 = pnand %p1055_p7, %p303_p8 }
   0xd   : > { %p349_p10 = scmp.lt.s32.totalorder (!%p304_p9), %s1337_s13, 1  ;;  %s339_s14 = sand.u32 (!%p304_p9), 1, %s1253_s10  }
   0xe   : > { %307 = sbr.rel (%p304_p9) target bundleno = 1662 (0x67e), region = 52  ;;  %s1056_s16 = sshll.u32 (!%p304_p9), %s339_s14, 2 }
   0xf   : > { %s1078_s17 = sshll.u32 (!%p304_p9), %s1337_s13, 6  ;;  %s935_s26 = scalar_lea.sflag (!%p304_p9), [#allocation3], %s339_s14 }
  0x13   : > { %s350_s21 = scalar_select %p349_p10, %s1337_s13, 1  ;;  %vm370_vm0 = vcmask 130048   ;;  %v368_v4 = vld [vmem:[%s1471_s2] sm:$0xff]  ;;  %vm458_vm1 = vcmask 64512   ;;  %v545_v7 = vld [vmem:[%s1473_s4 + $0x18] sm:$0xff]  ;;  %v544_v8 = vld [vmem:[%s1473_s4 + $0x10] sm:$0xff] }
  0x14   : > { %1115 = vmatprep.subr.mxu1 %v368_v4  ;;  %v543_v9 = vld [vmem:[%s1473_s4 + $0x8] sm:$0xff]  ;;  %v542_v10 = vld [vmem:[%s1473_s4] sm:$0xff]  ;;  %vm547_vm2 = vcmask 261120   ;;  %v1263_v21 = vmov 0.0   ;;  %vm802_vm3 = vcmask 31744   ;;  %vm1264_vm4 = vmmov 0  }
  0x15   : > { %s1366_s22 = sshll.u32 %s350_s21, 4  ;;  %1116 = vmatpush3.msra.mxu1 %v368_v4  ;;  %v1065_v11 = vld [vmem:[%s1472_s3] ss:$0 sm:$0xff]  ;;  %v713_v20 = vld [vmem:[%s1475_s6 + $0x8] sm:$0xff]  ;;  %s341_s21 = scalar_lea.vmem [#allocation2], %s1056_s16  ;;  %vm930_vm5 = vcmask 125952  }
  0x16   : > { %s353_s25 = scalar_lea.vmem %s1469_s0, %s1366_s22  ;;  %s358_s28 = scalar_lea.vmem %s1470_s1, %s1366_s22  ;;  %1120 = vmatprep.subr.mxu1 %v545_v7  ;;  %v712_v22 = vld [vmem:[%s1475_s6] sm:$0xff] }
  0x17   : > { %v367_v0 = vld [vmem:[%s353_s25 + $0x8] sm:$0xff]  ;;  %v366_v1 = vld [vmem:[%s353_s25] sm:$0xff]  ;;  %s363_s29 = scalar_lea.vmem %s1478_s9, %s1366_s22  ;;  %s953_s23 = sshll.u32 %s341_s21, 4  ;;  %s1430_s23 = int_to_ptr.vmem [resolvable:$true] %s953_s23 }
  0x18   : > { %1108 = vmatprep.subr.mxu0 %v367_v0  ;;  %v364_v2 = vld [vmem:[%s358_s28] sm:$0xff]  ;;  %v365_v3 = vld [vmem:[%s358_s28 + $0x8] sm:$0xff]  ;;  %s1428_s25 = scalar_lea.hbm %s1477_s8, %s1078_s17  ;;  %s1201_s27 = scalar_lea.vmem %s1430_s23, 64 }
  0x19   : > { %1109 = vmatpush3.msra.mxu0 %v367_v0  ;;  %1112 = vmatprep.mubr.msk.f32.mxu0 %vm370_vm0, %v364_v2  ;;  %v1070_v23 = vld [vmem:[%s1474_s5] ss:$0 sm:$0xff]  ;;  %p1202_p11 = scmp.ne.s32.totalorder %s1430_s23, %s1201_s27  ;;  %s1265_s13 = smov [#allocation2]  }
  0x1a   : > { %1110 = vmatprep.subr.mxu0 %v366_v1  ;;  %v1073_v31 = vld [vmem:[%s1476_s7] ss:$0 sm:$0xff]  ;;  %s1205_s28 = sshll.u32 %s1265_s13, 4  ;;  %s1206_s28 = int_to_ptr.vmem [resolvable:$false] %s1205_s28 }
  0x1b   : > { %1111 = vmatpush3.msra.mxu0 %v366_v1  ;;  %p1203_p12 = pnand %p1202_p11, %p1354_p5  ;;  %p1208_p0 = scmp.lt.s32.totalorder %s1430_s23, %s1206_s28 }
  0x1c   : > { %1113 = vmatmul.mubr.msk.f32.vlgmr.msra.gmra.mxu0 %vm370_vm0, %v365_v3 }
  0x1d   : > { %1135 = vmatprep.mubr.msk.f32.mxu0 %vm370_vm0, %v364_v2  ;;  %p1204_p13 = pneg %p1203_p12 }
  0xdc   : > { %v1114_v5 = vpop.f32.mrf.mxu0 }
  0xde   : > { %v443_v6 = vpop.f32.mrf.mxu0 }
  0xdf   : > { %1117 = vmatprep.mubr.msk.f32.mxu1 %vm458_vm1, %v443_v6 }
  0xe0   : > { %1118 = vmatmul.mubr.msk.f32.vlgmr.msra.gmra.mxu1 %vm458_vm1, %v1114_v5 }
  0xe1   : > { %1121 = vmatpush3.msra.mxu1 %v545_v7 }
  0xe2   : > { %1122 = vmatprep.subr.mxu1 %v544_v8 }
  0xe3   : > { %1123 = vmatpush3.msra.mxu1 %v544_v8 }
  0xe4   : > { %1124 = vmatprep.subr.mxu1 %v543_v9 }
  0xe5   : > { %1125 = vmatpush3.msra.mxu1 %v543_v9 }
  0xe6   : > { %1126 = vmatprep.subr.mxu1 %v542_v10 }
  0xe7   : > { %1127 = vmatpush3.msra.mxu1 %v542_v10 }
  0xe8   : > { %1145 = vmatprep.subr.mxu1 %v1263_v21 }
 0x1a0   : > { %v1119_v12 = vpop.f32.mrf.mxu1 }
 0x1a1   : > { %v537_v13 = vadd.f32 %v1119_v12, %v1065_v11 }
 0x1a2   : > { %v531_v14 = vpop.f32.mrf.mxu1 }
 0x1a3   : > { %v532_v15 = vadd.f32 %v1065_v11, %v531_v14  ;;  %v541_v17 = vmax.f32 %v537_v13, 0.0 }
 0x1a5   : > { %v540_v16 = vmax.f32 %v532_v15, 0.0 }
 0x1a7   : > { %1128 = vmatprep.mubr.msk.f32.mxu1 %vm547_vm2, %v540_v16 }
 0x1a8   : > { %1129 = vmatmul.mubr.msk.f32.vlgmr.msra.gmra.mxu1 %vm547_vm2, %v541_v17 }
 0x1a9   : > { %1149 = vmatprep.mubr.msk.f32.mxu1 %vm1264_vm4, %v1263_v21 }
 0x268   : > { %v1130_v18 = vpop.f32.mrf.mxu1 }
 0x269   : > { %1131 = vmatprep.subr.mxu0 %v1130_v18 }
 0x26a   : > { %v620_v19 = vpop.f32.mrf.mxu1  ;;  %1132 = vmatpush3.msra.mxu0 %v1130_v18 }
 0x26b   : > { %1133 = vmatprep.subr.mxu0 %v620_v19 }
 0x26c   : > { %1134 = vmatpush3.msra.mxu0 %v620_v19 }
 0x26d   : > { %1136 = vmatmul.mubr.msk.f32.vlgmr.msra.gmra.mxu0 %vm370_vm0, %v365_v3  ;;  %1138 = vmatprep.subr.mxu0 %v713_v20 }
 0x26e   : > { %1139 = vmatpush3.msra.mxu0 %v713_v20 }
 0x26f   : > { %1140 = vmatprep.subr.mxu0 %v712_v22 }
 0x270   : > { %1141 = vmatpush3.msra.mxu0 %v712_v22 }
 0x32d   : > { %v1137_v24 = vpop.f32.mrf.mxu0 }
 0x32e   : > { %v707_v25 = vadd.f32 %v1137_v24, %v1070_v23 }
 0x32f   : > { %v701_v26 = vpop.f32.mrf.mxu0 }
 0x330   : > { %v711_v27 = vmax.f32 %v707_v25, 0.0  ;;  %v702_v28 = vadd.f32 %v1070_v23, %v701_v26 }
 0x332   : > { %v710_v29 = vmax.f32 %v702_v28, 0.0  ;;  %1146 = vmatpush3.msra.mxu1 %v711_v27 }
 0x333   : > { %1147 = vmatprep.subr.mxu1 %v1263_v21 }
 0x334   : > { %1142 = vmatprep.mubr.msk.f32.mxu0 %vm370_vm0, %v710_v29  ;;  %1148 = vmatpush3.msra.mxu1 %v710_v29 }
 0x335   : > { %1143 = vmatmul.mubr.msk.f32.vlgmr.msra.gmra.mxu0 %vm370_vm0, %v711_v27 }
 0x3f5   : > { %v1144_v30 = vpop.f32.mrf.mxu0 }
 0x3f6   : > { %v799_v34 = vadd.f32 %v1144_v30, %v1073_v31 }
 0x3f7   : > { %v793_v32 = vpop.f32.mrf.mxu0 }
 0x3f8   : > { %v794_v33 = vadd.f32 %v1073_v31, %v793_v32  ;;  %v806_v36 = vsel %vm802_vm3, %v799_v34, -inf }
 0x3fa   : > { %v803_v35 = vsel %vm802_vm3, %v794_v33, -inf }
 0x3fb   : > { %804 = vmax.xlane.f32.xlu0 %v803_v35 }
 0x3ff   : > { %807 = vmax.xlane.f32.xlu0 %v806_v36 }
 0x484   : > { %v805_v37 = vpop.xlane.xlu0 %804 }
 0x485   : > { %v809_v38 = vsub.f32 %v794_v33, %v805_v37 }
 0x487   : > { %v811_v39 = vmul.f32 1.442695, %v809_v38 }
 0x488   : > { %v808_v40 = vpop.xlane.xlu0 %807 }
 0x489   : > { %1193 = vpow2.f32 %v811_v39  ;;  %v810_v41 = vsub.f32 %v799_v34, %v808_v40 }
 0x48b   : > { %v813_v42 = vmul.f32 1.442695, %v810_v41 }
 0x48d   : > { %1195 = vpow2.f32 %v813_v42 }
 0x496   : > { %v1194_v43 = vpop.eup %1193 }
 0x497   : > { %v815_v44 = vsel %vm802_vm3, %v1194_v43, 0.0 }
 0x498   : > { %816 = vadd.xlane.f32.xlu1 %v815_v44 }
 0x49a   : > { %v1196_v45 = vpop.eup %1195 }
 0x49b   : > { %v818_v46 = vsel %vm802_vm3, %v1196_v45, 0.0 }
 0x49c   : > { %819 = vadd.xlane.f32.xlu1 %v818_v46 }
 0x521   : > { %v817_v47 = vpop.xlane.xlu1 %816 }
 0x522   : > { %1197 = vrcp.f32 %v817_v47 }
 0x525   : > { %v820_v48 = vpop.xlane.xlu1 %819 }
 0x526   : > { %1199 = vrcp.f32 %v820_v48 }
 0x52f   : > { %v1198_v49 = vpop.eup %1197 }
 0x530   : > { %v823_v50 = vmul.f32 %v1198_v49, %v1194_v43 }
 0x532   : > { %825 = vxpose.xlu0.b32.start [1/2] (short) (narrow) %v823_v50, 8  ;;  %932 = vst.msk [vmem:[%s363_s29] sm:$0xff] %vm802_vm3, %v823_v50 }
 0x533   : > { %v1200_v51 = vpop.eup %1199 }
 0x534   : > { %v824_v52 = vmul.f32 %v1200_v51, %v1196_v45 }
 0x536   : > { %826 = vxpose.xlu0.b32.end [2/2] (short) (narrow) %v824_v52, 8  ;;  %933 = vst.msk [vmem:[%s363_s29 + $0x8] sm:$0xff] %vm802_vm3, %v824_v52  ;;  %s1207_s29 = scalar_lea.vmem %s1206_s28, 128 }
 0x537   : > { %p1209_p1 = scmp.lt.s32.totalorder %s1207_s29, %s1201_s27 }
 0x539   : > { %p1210_p2 = por %p1209_p1, %p1208_p0 }
 0x53b   : > { %p1211_p3 = pnand %p1210_p2, %p1204_p13 }
 0x5ae   : > { %v841_v53 = vpop.trf.xlu0 }
 0x5af   : > { %1150 = vmatmul.mubr.msk.f32.vlgmr.msra.gmra.mxu1 %vm370_vm0, %v841_v53 }
 0x66f   : > { %v926_v54 = vpop.f32.mrf.mxu1 }
 0x670   : > { %931 = vst.msk [vmem:[%s341_s21] sm:$0xf] %vm930_vm5, %v926_v54 }
 0x671   : > { %v1151_v55 = vpop.f32.mrf.mxu1 }
 0x672   : > { %1214 = shalt.err (!%p1211_p3)
}
 0x673   : > { %s1215_s16 = scalar_lea.hbm %s1428_s25, 64  ;;  %s1219_s21 = scalar_lea.hbm %s1477_s8, 128 }
 0x674   : > { %p1216_p4 = scmp.ne.s32.totalorder %s1428_s25, %s1215_s16  ;;  %p1220_p9 = scmp.lt.s32.totalorder %s1428_s25, %s1477_s8 }
 0x675   : > { %p1221_p10 = scmp.lt.s32.totalorder %s1219_s21, %s1215_s16 }
 0x676   : > { %p1217_p7 = pnand %p1216_p4, %p1354_p5 }
 0x677   : > { %p1222_p11 = por %p1221_p10, %p1220_p9 }
 0x678   : > { %p1218_p8 = pneg %p1217_p7 }
 0x67a   : > { %p1223_p12 = pnand %p1222_p11, %p1218_p8 }
 0x67c   : > { %1226 = shalt.err (!%p1223_p12)
}
 0x67d   : > { %1152 = dma.vmem_to_hbm [thread:$0]  (%p1354_p5), %s1430_s23, 64, %s1428_s25, %s935_s26  }
 0x67e PF: > { %p1158_p13 = scmp.ge.s32.totalorder %s1261_s12, 2  ;;  %s968_s27 = sand.u32 1, %s1249_s30  }
 0x67f   : > { %s969_s13 = scalar_lea.sflag [#allocation3], %s968_s27 }
 0x680   : > { %p1155_p0 = pnand %p1158_p13, %p1358_p6 }
 0x682   : > { %p1156_p1 = pneg %p1155_p0 }
 0x684   : > { %1244 = dma.done.wait (%p1156_p1), %s969_s13, 64  }
 0x685   : > { %1246 = vsyncadd (%p1156_p1), %s969_s13, 4294967232  ;;  %p20_p2 = scmp.ge.s32.totalorder %s1341_s15, 4   ;;  %s1481_s30 = smov %s1253_s10 }
 0x686   : > { %s1482_s10 = smov %s1257_s11  ;;  %s1483_s11 = smov %s1352_s18 }
 0x687   : > { %s1484_s12 = smov %s1341_s15  ;;  %22 = sbr.rel (!%p20_p2) target bundleno = 3 (0x3), region = 102 }
 0x68c   :  { %982 = vsyncpa [#allocation3], 1 }
 0x68d   :  { %984 = vsyncpa [#allocation3 + $0x1], 1 }

</bundles_post_ra>
